<compile_context>
chip_gen: v5e
topology: v5e:2x2
jax: 0.10.0
libtpu: 0.0.40
codegen_flags: <defaults>
</compile_context>

<pallas_src>
import math
import jax
import jax.numpy as jnp
from jax.experimental import pallas as pl
from jax.experimental.pallas import tpu as pltpu

HIDDEN_FC1 = 128        # fc1 output width (nn.Linear(num_inputs, 128))
LSTM_HIDDEN = 16        # only used for the pass-through hidden-state shape
ROW_QUANTUM = 16        # row tile quantum: covers f32 (8) and bf16 (16) sublane packing
DEFAULT_TILE_B = 2048   # batch rows per grid step for large (T*B) calls


def _round_up(v, m):
    return -(-v // m) * m


def _choose_tiling(batch, tile_b):
    """(padded_rows, row_tile): minimal row padding, tile <= tile_b, and >=2
    grid steps whenever there are enough rows (v7x: both TensorCores busy)."""
    rows = _round_up(max(batch, 1), ROW_QUANTUM)
    n_tiles = max(1, -(-rows // max(tile_b, ROW_QUANTUM)))
    if n_tiles == 1 and rows >= 2 * ROW_QUANTUM:
        n_tiles = 2
    tb = _round_up(-(-rows // n_tiles), ROW_QUANTUM)
    return n_tiles * tb, tb


def _drqn_kernel(x_ref, w1_ref, b1_ref, w2_ref, b2_ref, q_ref):
    # fc1 + ReLU: K = natural feature width (zero-padded to a multiple of 8
    # at init; padded columns contribute 0). f32 accumulate on the MXU.
    h = jnp.dot(x_ref[...], w1_ref[...], preferred_element_type=jnp.float32)
    h = jnp.maximum(h + b1_ref[...], 0.0)               # (tb, 128) + (1, 128)
    # fc2: compact (tb, num_outputs) result — no 128-wide N padding.
    q = jnp.dot(h.astype(w2_ref.dtype), w2_ref[...],
                preferred_element_type=jnp.float32)
    q_ref[...] = (q + b2_ref[...]).astype(q_ref.dtype)


def drqn_forward(x, params, hidden=None, *,
                 tile_b=DEFAULT_TILE_B, use_bf16=False):
    """Pallas-backed DRQN.forward: returns (qvalue, hidden).

    x: (batch, num_inputs). For per-timestep rollouts, fold time into the
       leading axis, i.e. pass (T*B, num_inputs) in a single call.
    params: kernel-ready params dict from init_params.
    use_bf16: feed bf16 MXU inputs with f32 accumulation. Recommended for
       acting/inference on v5e/v6e/v7x (halves the dominant x-read bytes);
       keep False when exact f32 parity with the PyTorch forward is needed
       (e.g. TD-target computation).
    """
    b1 = params["b1"]                                    # (1, 128) f32
    b2 = params["b2"]                                    # (1, num_outputs) f32
    w1 = params["w1_bf16"] if use_bf16 else params["w1_f32"]   # (k_pad, 128)
    w2 = params["w2_bf16"] if use_bf16 else params["w2_f32"]   # (128, num_outputs)
    k_pad = w1.shape[0]
    num_outputs = b2.shape[1]
    batch, num_inputs = x.shape
    assert num_inputs <= k_pad, "x feature width does not match init_params"

    if hidden is None:
        # equivalent of init_hidden(batch_size) for a 1-layer LSTM(128, 16)
        hidden = (jnp.zeros((1, batch, LSTM_HIDDEN), jnp.float32),
                  jnp.zeros((1, batch, LSTM_HIDDEN), jnp.float32))
    # TODO(synk): the nn.LSTM is unused in the PyTorch forward(); hidden is a
    # pass-through only, so no recurrent compute is implemented here.

    b_pad, tb = _choose_tiling(batch, tile_b)
    in_dtype = jnp.bfloat16 if use_bf16 else jnp.float32

    if b_pad == batch and k_pad == num_inputs and x.dtype == in_dtype:
        x_in = x                                         # zero-copy fast path
    else:
        # single fused pad+cast directly in the MXU input dtype
        x_in = jnp.zeros((b_pad, k_pad), in_dtype).at[:batch, :num_inputs].set(
            x.astype(in_dtype))

    in_bytes = 2 if use_bf16 else 4
    est = (2 * tb * (k_pad * in_bytes + num_outputs * 4)            # x/q double-buffered
           + 2 * (k_pad * HIDDEN_FC1 + HIDDEN_FC1 * num_outputs) * in_bytes  # weights
           + (2 << 20))                                              # slack
    vmem_limit = int(min(max(est, 16 << 20), 48 << 20))

    q_pad = pl.pallas_call(
        _drqn_kernel,
        out_shape=jax.ShapeDtypeStruct((b_pad, num_outputs), jnp.float32),
        grid=(b_pad // tb,),
        in_specs=[
            pl.BlockSpec((tb, k_pad), lambda i: (i, 0)),                # x row tile
            pl.BlockSpec((k_pad, HIDDEN_FC1), lambda i: (0, 0)),        # w1 (resident)
            pl.BlockSpec((1, HIDDEN_FC1), lambda i: (0, 0)),            # b1
            pl.BlockSpec((HIDDEN_FC1, num_outputs), lambda i: (0, 0)),  # w2 (resident)
            pl.BlockSpec((1, num_outputs), lambda i: (0, 0)),           # b2
        ],
        out_specs=pl.BlockSpec((tb, num_outputs), lambda i: (i, 0)),
        compiler_params=pltpu.CompilerParams(
            dimension_semantics=("parallel",),   # batch axis: megacore / v7x 2-TC split
            vmem_limit_bytes=vmem_limit),
    )(x_in, w1, b1, w2, b2)

    q = q_pad if b_pad == batch else q_pad[:batch]       # rows only; columns are exact
    return q, hidden


def init_params(key, num_inputs, num_outputs):
    """Kernel-ready params (K rounded to a multiple of 8, pre-transposed,
    biases as (1, N), bf16 weight copies pre-cast) plus the logical params for
    reference checks. Matches nn.Linear with xavier_uniform weights and
    PyTorch's default uniform bias init."""
    k1, k2, k3, k4 = jax.random.split(key, 4)

    def xavier_uniform(k, fan_in, fan_out):
        bound = math.sqrt(6.0 / (fan_in + fan_out))
        # stored pre-transposed: (in_features, out_features)
        return jax.random.uniform(k, (fan_in, fan_out), jnp.float32, -bound, bound)

    def linear_bias(k, fan_in, fan_out):
        bound = 1.0 / math.sqrt(fan_in)
        return jax.random.uniform(k, (fan_out,), jnp.float32, -bound, bound)

    w1 = xavier_uniform(k1, num_inputs, HIDDEN_FC1)      # (num_inputs, 128)
    b1 = linear_bias(k2, num_inputs, HIDDEN_FC1)         # (128,)
    w2 = xavier_uniform(k3, HIDDEN_FC1, num_outputs)     # (128, num_outputs)
    b2 = linear_bias(k4, HIDDEN_FC1, num_outputs)        # (num_outputs,)

    k_pad = _round_up(num_inputs, 8)                     # tiny pad, NOT 128
    w1p = jnp.zeros((k_pad, HIDDEN_FC1), jnp.float32).at[:num_inputs, :].set(w1)

    params = {
        "w1_f32": w1p,
        "w2_f32": w2,
        "w1_bf16": w1p.astype(jnp.bfloat16),             # pre-cast once, not per call
        "w2_bf16": w2.astype(jnp.bfloat16),
        "b1": b1.reshape(1, HIDDEN_FC1),
        "b2": b2.reshape(1, num_outputs),
    }
    return params, (w1, b1, w2, b2)


if __name__ == "__main__":
    num_inputs, num_outputs, batch = 16, 4, 2
    key = jax.random.PRNGKey(0)
    kp, kx = jax.random.split(key)

    params, (w1, b1, w2, b2) = init_params(kp, num_inputs, num_outputs)
    x = jax.random.normal(kx, (batch, num_inputs), jnp.float32)

    # f32 path (matches the PyTorch forward numerically)
    qvalue, hidden = drqn_forward(x, params)
    jax.block_until_ready(qvalue)
    ref = jnp.maximum(x @ w1 + b1, 0.0) @ w2 + b2
    assert qvalue.shape == (batch, num_outputs)
    assert hidden[0].shape == (1, batch, LSTM_HIDDEN)
    assert jnp.allclose(qvalue, ref, atol=1e-5, rtol=1e-5)

    # bf16-MXU path (recommended on v5e/v6e/v7x for acting), loose tolerance
    q_bf16, _ = drqn_forward(x, params, use_bf16=True)
    jax.block_until_ready(q_bf16)
    assert jnp.allclose(q_bf16, ref, atol=1e-1, rtol=1e-1)

    # multi-tile "T*B rows in one call" path: batch=1056 now tiles as 2x528
    # (zero row padding, zero wrapper copies of x, 2 parallel grid steps)
    big_x = jax.random.normal(jax.random.PRNGKey(1), (1056, num_inputs), jnp.float32)
    q_big, _ = drqn_forward(big_x, params)
    jax.block_until_ready(q_big)
    ref_big = jnp.maximum(big_x @ w1 + b1, 0.0) @ w2 + b2
    assert q_big.shape == (1056, num_outputs)
    assert jnp.allclose(q_big, ref_big, atol=1e-4, rtol=1e-4)

    print("KERNEL_OK")
</pallas_src>

<mosaic_0001>
module attributes {stable_mosaic.version = 11 : i64} {
  func.func @_drqn_kernel(%arg0: i32, %arg1: memref<16x16xf32, #tpu.memory_space<vmem>>, %arg2: memref<16x128xf32, #tpu.memory_space<vmem>>, %arg3: memref<1x128xf32, #tpu.memory_space<vmem>>, %arg4: memref<128x4xf32, #tpu.memory_space<vmem>>, %arg5: memref<1x4xf32, #tpu.memory_space<vmem>>, %arg6: memref<16x4xf32, #tpu.memory_space<vmem>>) attributes {dimension_semantics = [#tpu.dimension_semantics<parallel>], iteration_bounds = array<i64: 1>, scalar_prefetch = 0 : i64, scratch_operands = 0 : i64, tpu.core_type = #tpu.core_type<tc>, window_params = [{transform_indices = @transform_0, window_bounds = array<i64: 16, 16>}, {pipeline_mode = #tpu.pipeline_mode<synchronous>, transform_indices = @transform_1, window_bounds = array<i64: 16, 128>}, {pipeline_mode = #tpu.pipeline_mode<synchronous>, transform_indices = @transform_2, window_bounds = array<i64: 1, 128>}, {pipeline_mode = #tpu.pipeline_mode<synchronous>, transform_indices = @transform_3, window_bounds = array<i64: 128, 4>}, {pipeline_mode = #tpu.pipeline_mode<synchronous>, transform_indices = @transform_4, window_bounds = array<i64: 1, 4>}, {transform_indices = @transform_5, window_bounds = array<i64: 16, 4>}]} {
    %c0 = arith.constant 0 : index
    %c0_0 = arith.constant 0 : index
    %0 = vector.load %arg1[%c0, %c0_0] : memref<16x16xf32, #tpu.memory_space<vmem>>, vector<16x16xf32>
    %c0_1 = arith.constant 0 : index
    %c0_2 = arith.constant 0 : index
    %1 = vector.load %arg2[%c0_1, %c0_2] : memref<16x128xf32, #tpu.memory_space<vmem>>, vector<16x128xf32>
    %cst = arith.constant dense<0.000000e+00> : vector<16x128xf32>
    %2 = tpu.matmul %0, %1, %cst {dimension_numbers = #tpu.dot_dimension_numbers<[1], [0], [0], [1], [0, 0, 1, 1], [], []>} : vector<16x16xf32>, vector<16x128xf32>, vector<16x128xf32> -> vector<16x128xf32>
    %c0_3 = arith.constant 0 : index
    %c0_4 = arith.constant 0 : index
    %3 = vector.load %arg3[%c0_3, %c0_4] : memref<1x128xf32, #tpu.memory_space<vmem>>, vector<1x128xf32>
    %4 = vector.broadcast %3 : vector<1x128xf32> to vector<16x128xf32>
    %5 = arith.addf %2, %4 : vector<16x128xf32>
    %cst_5 = arith.constant 0.000000e+00 : f32
    %6 = vector.broadcast %cst_5 : f32 to vector<16x128xf32>
    %7 = arith.maximumf %5, %6 : vector<16x128xf32>
    %c0_6 = arith.constant 0 : index
    %c0_7 = arith.constant 0 : index
    %8 = vector.load %arg4[%c0_6, %c0_7] : memref<128x4xf32, #tpu.memory_space<vmem>>, vector<128x4xf32>
    %cst_8 = arith.constant dense<0.000000e+00> : vector<16x4xf32>
    %9 = tpu.matmul %7, %8, %cst_8 {dimension_numbers = #tpu.dot_dimension_numbers<[1], [0], [0], [1], [0, 0, 1, 1], [], []>} : vector<16x128xf32>, vector<128x4xf32>, vector<16x4xf32> -> vector<16x4xf32>
    %c0_9 = arith.constant 0 : index
    %c0_10 = arith.constant 0 : index
    %10 = vector.load %arg5[%c0_9, %c0_10] : memref<1x4xf32, #tpu.memory_space<vmem>>, vector<1x4xf32>
    %11 = vector.broadcast %10 : vector<1x4xf32> to vector<16x4xf32>
    %12 = arith.addf %9, %11 : vector<16x4xf32>
    %c0_11 = arith.constant 0 : index
    %c0_12 = arith.constant 0 : index
    %13 = vector.load %arg6[%c0_11, %c0_12] : memref<16x4xf32, #tpu.memory_space<vmem>>, vector<16x4xf32>
    tpu.vector_store %arg6[%c0_11, %c0_12], %12 {strides = array<i32>} : memref<16x4xf32, #tpu.memory_space<vmem>>, vector<16x4xf32>,
    return
  }
  func.func @transform_0(%arg0: i32) -> (i32, i32) {
    %c0_i32 = arith.constant 0 : i32
    %c0_i32_0 = arith.constant 0 : i32
    return %arg0, %c0_i32 : i32, i32
  }
  func.func @transform_1(%arg0: i32) -> (i32, i32) {
    %c0_i32 = arith.constant 0 : i32
    %c0_i32_0 = arith.constant 0 : i32
    %c0_i32_1 = arith.constant 0 : i32
    return %c0_i32, %c0_i32_0 : i32, i32
  }
  func.func @transform_2(%arg0: i32) -> (i32, i32) {
    %c0_i32 = arith.constant 0 : i32
    %c0_i32_0 = arith.constant 0 : i32
    %c0_i32_1 = arith.constant 0 : i32
    return %c0_i32, %c0_i32_0 : i32, i32
  }
  func.func @transform_3(%arg0: i32) -> (i32, i32) {
    %c0_i32 = arith.constant 0 : i32
    %c0_i32_0 = arith.constant 0 : i32
    %c0_i32_1 = arith.constant 0 : i32
    return %c0_i32, %c0_i32_0 : i32, i32
  }
  func.func @transform_4(%arg0: i32) -> (i32, i32) {
    %c0_i32 = arith.constant 0 : i32
    %c0_i32_0 = arith.constant 0 : i32
    %c0_i32_1 = arith.constant 0 : i32
    return %c0_i32, %c0_i32_0 : i32, i32
  }
  func.func @transform_5(%arg0: i32) -> (i32, i32) {
    %c0_i32 = arith.constant 0 : i32
    %c0_i32_0 = arith.constant 0 : i32
    return %arg0, %c0_i32 : i32, i32
  }
}

</mosaic_0001>

<bundles_post_ra>
// kernel: tpu_custom_call.1
= control target key start
LH: loop header
LB: loop body
LE: loop exit
PB: predicated region body
PF: predicated region fallthrough
CT: control target
= control target key end

     0   :  { %vm28_vm0 = vcmask 130048   ;;  %vm103_vm1 = vcmask 31744   ;;  %s234_s1 = inlined_call_operand.vmem [shape: f32[16,128], index: 1, kind: input, shape index: {}]   ;;  %s235_s0 = inlined_call_operand.vmem [shape: f32[16,16], index: 0, kind: input, shape index: {}]   ;;  %s236_s3 = inlined_call_operand.vmem [shape: f32[128,4], index: 3, kind: input, shape index: {}]   ;;  %s237_s2 = inlined_call_operand.vmem [shape: f32[1,128], index: 2, kind: input, shape index: {}]   ;;  %s238_s4 = inlined_call_operand.vmem [shape: f32[1,4], index: 4, kind: input, shape index: {}]   ;;  %s239_s5 = inlined_call_operand.vmem [shape: f32[16,4], index: 5, kind: output, shape index: {}]  }
   0x1   :  { %v23_v0 = vld [vmem:[%s234_s1 + $0x8] sm:$0xff]  ;;  %v22_v1 = vld [vmem:[%s234_s1] sm:$0xff]  ;;  %v75_v3 = vld [vmem:[%s236_s3 + $0x78] sm:$0xff] }
   0x2   :  { %49 = vmatpush.msra.mxu0 %v23_v0  ;;  %v20_v2 = vld [vmem:[%s235_s0] sm:$0xff]  ;;  %v74_v4 = vld [vmem:[%s236_s3 + $0x70] sm:$0xff]  ;;  %80 = vmatpush.msra.mxu1 %v75_v3  ;;  %v73_v5 = vld [vmem:[%s236_s3 + $0x68] sm:$0xff] }
   0x3   :  { %112 = vmatpush.msra.mxu2 %v75_v3  ;;  %v72_v6 = vld [vmem:[%s236_s3 + $0x60] sm:$0xff]  ;;  %v71_v7 = vld [vmem:[%s236_s3 + $0x58] sm:$0xff]  ;;  %v21_v8 = vld [vmem:[%s235_s0 + $0x8] sm:$0xff] }
   0x4   :  { %50 = vmatpush.msra.mxu0 %v22_v1  ;;  %81 = vmatpush.msra.mxu1 %v74_v4  ;;  %v70_v9 = vld [vmem:[%s236_s3 + $0x50] sm:$0xff]  ;;  %v69_v10 = vld [vmem:[%s236_s3 + $0x48] sm:$0xff]  ;;  %v68_v11 = vld [vmem:[%s236_s3 + $0x40] sm:$0xff] }
   0x5   :  { %110 = vmatmul.msk.f32.vlgmr.msra.gmra.mxu0 %vm28_vm0, %v20_v2  ;;  %113 = vmatpush.msra.mxu2 %v74_v4  ;;  %v67_v12 = vld [vmem:[%s236_s3 + $0x38] sm:$0xff]  ;;  %v66_v13 = vld [vmem:[%s236_s3 + $0x30] sm:$0xff]  ;;  %v65_v14 = vld [vmem:[%s236_s3 + $0x28] sm:$0xff] }
   0x6   :  { %82 = vmatpush.msra.mxu1 %v73_v5  ;;  %v64_v15 = vld [vmem:[%s236_s3 + $0x20] sm:$0xff]  ;;  %v63_v16 = vld [vmem:[%s236_s3 + $0x18] sm:$0xff]  ;;  %v62_v17 = vld [vmem:[%s236_s3 + $0x10] sm:$0xff] }
   0x7   :  { %114 = vmatpush.msra.mxu2 %v73_v5  ;;  %v61_v18 = vld [vmem:[%s236_s3 + $0x8] sm:$0xff]  ;;  %v60_v19 = vld [vmem:[%s236_s3] sm:$0xff] }
   0x8   :  { %83 = vmatpush.msra.mxu1 %v72_v6  ;;  %v128_v20 = vld [vmem:[%s237_s2] ss:$0 sm:$0xff] }
   0x9   :  { %115 = vmatpush.msra.mxu2 %v72_v6  ;;  %v129_v27 = vld [vmem:[%s238_s4] ss:$0 sm:$0xff] }
   0xa   :  { %84 = vmatpush.msra.mxu1 %v71_v7 }
   0xb   :  { %116 = vmatpush.msra.mxu2 %v71_v7 }
   0xc   :  { %85 = vmatpush.msra.mxu1 %v70_v9 }
   0xd   :  { %111 = vmatmul.msk.f32.gmra.mxu0 %vm28_vm0, %v21_v8  ;;  %117 = vmatpush.msra.mxu2 %v70_v9 }
   0xe   :  { %86 = vmatpush.msra.mxu1 %v69_v10 }
   0xf   :  { %118 = vmatpush.msra.mxu2 %v69_v10 }
  0x10   :  { %87 = vmatpush.msra.mxu1 %v68_v11 }
  0x11   :  { %119 = vmatpush.msra.mxu2 %v68_v11 }
  0x12   :  { %88 = vmatpush.msra.mxu1 %v67_v12 }
  0x13   :  { %120 = vmatpush.msra.mxu2 %v67_v12 }
  0x14   :  { %89 = vmatpush.msra.mxu1 %v66_v13 }
  0x15   :  { %121 = vmatpush.msra.mxu2 %v66_v13 }
  0x16   :  { %90 = vmatpush.msra.mxu1 %v65_v14 }
  0x17   :  { %122 = vmatpush.msra.mxu2 %v65_v14 }
  0x18   :  { %91 = vmatpush.msra.mxu1 %v64_v15 }
  0x19   :  { %123 = vmatpush.msra.mxu2 %v64_v15 }
  0x1a   :  { %92 = vmatpush.msra.mxu1 %v63_v16 }
  0x1b   :  { %124 = vmatpush.msra.mxu2 %v63_v16 }
  0x1c   :  { %93 = vmatpush.msra.mxu1 %v62_v17 }
  0x1d   :  { %125 = vmatpush.msra.mxu2 %v62_v17 }
  0x1e   :  { %94 = vmatpush.msra.mxu1 %v61_v18 }
  0x1f   :  { %126 = vmatpush.msra.mxu2 %v61_v18 }
  0x20   :  { %95 = vmatpush.msra.mxu1 %v60_v19 }
  0x21   :  { %127 = vmatpush.msra.mxu2 %v60_v19 }
  0x82   :  { %v52_v21 = vpop.f32.mrf.mxu0 }
  0x83   :  { %v53_v22 = vadd.f32 %v128_v20, %v52_v21 }
  0x85   :  { %v58_v23 = vmax.f32 %v53_v22, 0.0 }
  0x87   :  { %96 = vmatmul.f32.vlgmr.msra.gmra.mxu1 %v58_v23 }
  0x8a   :  { %v55_v24 = vpop.f32.mrf.mxu0 }
  0x8b   :  { %v56_v25 = vadd.f32 %v128_v20, %v55_v24 }
  0x8d   :  { %v59_v26 = vmax.f32 %v56_v25, 0.0 }
  0x8f   :  { %99 = vmatmul.f32.vlgmr.msra.gmra.mxu2 %v59_v26 }
 0x104   :  { %v97_v28 = vpop.f32.mrf.mxu1 }
 0x105   :  { %v98_v29 = vadd.f32 %v129_v27, %v97_v28 }
 0x107   :  { %104 = vst.msk [vmem:[%s239_s5] sm:$0xff] %vm103_vm1, %v98_v29 }
 0x112   :  { %v100_v30 = vpop.f32.mrf.mxu2 }
 0x113   :  { %v101_v31 = vadd.f32 %v129_v27, %v100_v30 }
 0x115   :  { %105 = vst.msk [vmem:[%s239_s5 + $0x8] sm:$0xff] %vm103_vm1, %v101_v31 }

</bundles_post_ra>
